<compile_context>
chip_gen: v6e
topology: v6e:2x2x1
jax: 0.10.0
libtpu: 0.0.40
codegen_flags: <defaults>
</compile_context>

<pallas_src>
import functools
import math

import jax
import jax.numpy as jnp
from jax.experimental import pallas as pl
from jax.experimental.pallas import tpu as pltpu


def _round_up(a, b):
    return (a + b - 1) // b * b


# --------------------------- pass 1: logits + online lse ---------------------
def _logits_lse_kernel(x_ref, w_ref, b_ref, o_ref, lse_ref, m_ref, l_ref,
                       *, vocab, tv):
    # x_ref: (tm, d_model) bf16    w_ref: (d_model, tv) bf16    b_ref: (1, tv) f32
    # o_ref: (tm, tv) f32 streamed logits tile    lse_ref: (tm, 1) f32
    # m_ref / l_ref: (tm, 1) f32 scratch for the online logsumexp.
    j = pl.program_id(1)

    @pl.when(j == 0)
    def _init():
        m_ref[...] = jnp.full(m_ref.shape, -jnp.inf, m_ref.dtype)
        l_ref[...] = jnp.zeros(l_ref.shape, l_ref.dtype)

    # MXU: bf16 operands, f32 accumulation.
    logits = jnp.dot(x_ref[...], w_ref[...], preferred_element_type=jnp.float32)
    logits = logits + b_ref[...]                                     # (tm, tv)

    # Logsumexp math over valid vocab columns only.  W / bias are NOT padded in
    # HBM; a ragged last tile is masked here instead (skipped entirely when tv
    # divides vocab).
    if vocab % tv != 0:
        col = jax.lax.broadcasted_iota(jnp.int32, logits.shape, 1) + j * tv
        lse_in = jnp.where(col < vocab, logits, -jnp.inf)
    else:
        lse_in = logits

    m_prev = m_ref[...]
    m_new = jnp.maximum(m_prev, jnp.max(lse_in, axis=-1, keepdims=True))
    alpha = jnp.exp(m_prev - m_new)
    l_ref[...] = alpha * l_ref[...] + jnp.sum(jnp.exp(lse_in - m_new),
                                              axis=-1, keepdims=True)
    m_ref[...] = m_new

    # Stream the raw f32 logits tile (lane-dense (tm, tv) block).
    o_ref[...] = logits.astype(o_ref.dtype)

    # Emit the per-row logsumexp once all vocab tiles of this row tile are done.
    @pl.when(j == pl.num_programs(1) - 1)
    def _emit_lse():
        lse_ref[...] = m_ref[...] + jnp.log(l_ref[...])


# --------------------------- pass 2: logits - lse ----------------------------
def _sub_lse_kernel(logits_ref, lse_ref, o_ref):
    # f32 subtraction, single cast to the output dtype.
    o_ref[...] = (logits_ref[...] - lse_ref[...]).astype(o_ref.dtype)


# --------------------------------- wrapper -----------------------------------
def linear_log_softmax(x, w_t, b, *, tile_m=512, tile_v=1024,
                       out_dtype=jnp.float32):
    """Returns log_softmax(x @ w_t + b, axis=-1).

    x:   (..., d_model)
    w_t: (d_model, vocab)  -- transposed nn.Linear weight
    b:   (vocab,)
    Output: (..., vocab) in out_dtype (subtraction always done in f32).
    For a repeatedly-called LM head, pre-cast w_t to bfloat16 once at init to
    avoid the per-call cast pass over the weight.
    """
    orig_shape = x.shape
    d_model = orig_shape[-1]
    vocab = w_t.shape[1]
    x2 = x.reshape(-1, d_model)
    n = x2.shape[0]

    # Row tile: multiple of 16, adapted to n; keep >= 2 row tiles when the
    # batch is big enough so the v7x 2-TensorCore "parallel" split has work.
    tm = _round_up(min(tile_m, _round_up(n, 16)), 16)
    if n > 256 and pl.cdiv(n, tm) < 2:
        tm = _round_up(pl.cdiv(n, 2), 16)
    n_pad = _round_up(n, tm)
    n_row_tiles = n_pad // tm

    # Vocab tile: lane-dense multiple of 128; last tile may be ragged (masked
    # in-kernel, never padded in HBM).
    tv = _round_up(min(tile_v, _round_up(vocab, 128)), 128)
    nv = pl.cdiv(vocab, tv)

    # MXU operands in bf16 (f32 accumulation inside), bias in f32.  x / b casts
    # are tiny; the weight cast is skipped when w_t is already bf16.
    x_bf = x2.astype(jnp.bfloat16)
    if n_pad != n:
        x_bf = jnp.pad(x_bf, ((0, n_pad - n), (0, 0)))
    w_in = w_t if w_t.dtype == jnp.bfloat16 else w_t.astype(jnp.bfloat16)
    b_in = b.astype(jnp.float32).reshape(1, vocab)
    w_isz = jnp.dtype(w_in.dtype).itemsize
    out_isz = jnp.dtype(out_dtype).itemsize

    # ---- pass 1: streamed logits + per-row lse ----
    vmem1 = (2 * tm * d_model * 2          # x tile (bf16), resident over vocab axis
             + 2 * d_model * tv * w_isz    # streamed weight tile, double-buffered
             + 2 * tv * 4                  # bias tile
             + 2 * tm * tv * 4             # streamed f32 logits output tile
             + 4 * tm * 4                  # lse output block + m/l scratch
             + tm * tv * 4)                # in-kernel f32 temporaries headroom
    vmem1_limit = max(min(vmem1 * 3 // 2, 128 * 2**20), 32 * 2**20, vmem1)

    cost1 = pl.CostEstimate(
        flops=2 * n * d_model * vocab,
        transcendentals=n * vocab,
        bytes_accessed=(n_pad * d_model * 2                         # x (read once per row tile)
                        + n_row_tiles * (d_model * vocab * w_isz    # W re-streamed per row tile
                                         + vocab * 4)               # bias re-streamed per row tile
                        + n_pad * vocab * 4                         # logits write
                        + n_pad * 4),                               # lse write
    )

    logits, lse = pl.pallas_call(
        functools.partial(_logits_lse_kernel, vocab=vocab, tv=tv),
        out_shape=(jax.ShapeDtypeStruct((n_pad, vocab), jnp.float32),
                   jax.ShapeDtypeStruct((n_pad, 1), jnp.float32)),
        grid_spec=pltpu.PrefetchScalarGridSpec(
            num_scalar_prefetch=0,
            grid=(n_row_tiles, nv),
            in_specs=[
                pl.BlockSpec((tm, d_model), lambda i, j: (i, 0)),
                pl.BlockSpec((d_model, tv), lambda i, j: (0, j)),
                pl.BlockSpec((1, tv), lambda i, j: (0, j)),
            ],
            out_specs=[
                pl.BlockSpec((tm, tv), lambda i, j: (i, j)),   # streamed logits
                pl.BlockSpec((tm, 1), lambda i, j: (i, 0)),    # per-row lse
            ],
            scratch_shapes=[
                pltpu.VMEM((tm, 1), jnp.float32),   # running max m
                pltpu.VMEM((tm, 1), jnp.float32),   # running (rescaled) sum l
            ],
        ),
        compiler_params=pltpu.CompilerParams(
            dimension_semantics=("parallel", "arbitrary"),
            vmem_limit_bytes=int(vmem1_limit),
        ),
        cost_estimate=cost1,
    )(x_bf, w_in, b_in)

    # ---- pass 2: log-probs = logits - lse (mem-bound elementwise) ----
    tv2 = _round_up(min(2048, _round_up(vocab, 128)), 128)
    nv2 = pl.cdiv(vocab, tv2)
    vmem2 = 2 * tm * tv2 * (4 + out_isz) + 2 * tm * 4
    vmem2_limit = max(min(vmem2 * 3 // 2, 128 * 2**20), 32 * 2**20, vmem2)
    cost2 = pl.CostEstimate(
        flops=n * vocab,
        transcendentals=0,
        bytes_accessed=n_pad * vocab * 4 + n_pad * 4 + n * vocab * out_isz,
    )

    out = pl.pallas_call(
        _sub_lse_kernel,
        out_shape=jax.ShapeDtypeStruct((n, vocab), out_dtype),
        grid_spec=pltpu.PrefetchScalarGridSpec(
            num_scalar_prefetch=0,
            grid=(n_row_tiles, nv2),
            in_specs=[
                pl.BlockSpec((tm, tv2), lambda i, j: (i, j)),
                pl.BlockSpec((tm, 1), lambda i, j: (i, 0)),
            ],
            out_specs=pl.BlockSpec((tm, tv2), lambda i, j: (i, j)),
        ),
        compiler_params=pltpu.CompilerParams(
            dimension_semantics=("parallel", "parallel"),
            vmem_limit_bytes=int(vmem2_limit),
        ),
        cost_estimate=cost2,
    )(logits, lse)

    return out.reshape(*orig_shape[:-1], vocab)


if __name__ == "__main__":
    d_model = 32
    vocab_size = 128
    batch, seq = 2, 8

    key = jax.random.PRNGKey(0)
    kx, kw, kb = jax.random.split(key, 3)

    # Deterministic nn.Linear-style init: U(-1/sqrt(d_model), 1/sqrt(d_model)).
    bound = 1.0 / math.sqrt(d_model)
    # PyTorch weight is (vocab, d_model); we keep its transpose (d_model, vocab).
    w_t = jax.random.uniform(kw, (d_model, vocab_size), jnp.float32, -bound, bound)
    b = jax.random.uniform(kb, (vocab_size,), jnp.float32, -bound, bound)
    x = jax.random.normal(kx, (batch, seq, d_model), jnp.float32)

    out = jax.block_until_ready(linear_log_softmax(x, w_t, b))

    # Reference with the same bf16 matmul operands / f32 accumulation.
    ref_logits = jnp.dot(x.astype(jnp.bfloat16).reshape(-1, d_model),
                         w_t.astype(jnp.bfloat16),
                         preferred_element_type=jnp.float32) + b
    ref = jax.nn.log_softmax(ref_logits, axis=-1).reshape(batch, seq, vocab_size)

    assert out.shape == (batch, seq, vocab_size)
    err = float(jnp.max(jnp.abs(out - ref)))
    assert err < 1e-3, err

    print("KERNEL_OK")
</pallas_src>

<mosaic_0001>
module attributes {stable_mosaic.version = 11 : i64} {
  func.func @_logits_lse_kernel(%arg0: i32, %arg1: i32, %arg2: memref<16x32xbf16, #tpu.memory_space<vmem>>, %arg3: memref<32x128xbf16, #tpu.memory_space<vmem>>, %arg4: memref<1x128xf32, #tpu.memory_space<vmem>>, %arg5: memref<16x128xf32, #tpu.memory_space<vmem>>, %arg6: memref<16x1xf32, #tpu.memory_space<vmem>>, %arg7: memref<16x1xf32, #tpu.memory_space<vmem>>, %arg8: memref<16x1xf32, #tpu.memory_space<vmem>>) attributes {dimension_semantics = [#tpu.dimension_semantics<parallel>, #tpu.dimension_semantics<arbitrary>], iteration_bounds = array<i64: 1, 1>, scalar_prefetch = 0 : i64, scratch_operands = 2 : i64, tpu.core_type = #tpu.core_type<tc>, window_params = [{transform_indices = @transform_0, window_bounds = array<i64: 16, 32>}, {transform_indices = @transform_1, window_bounds = array<i64: 32, 128>}, {transform_indices = @transform_2, window_bounds = array<i64: 1, 128>}, {transform_indices = @transform_3, window_bounds = array<i64: 16, 128>}, {transform_indices = @transform_4, window_bounds = array<i64: 16, 1>}]} {
    %c0_i32 = arith.constant 0 : i32
    %0 = arith.cmpi eq, %arg1, %c0_i32 : i32
    %1 = arith.extui %0 : i1 to i32
    %c0_i32_0 = arith.constant 0 : i32
    %2 = arith.cmpi ne, %1, %c0_i32_0 : i32
    scf.if %2 {
      %cst_20 = arith.constant 0xFF800000 : f32
      %29 = vector.broadcast %cst_20 : f32 to vector<16x1xf32>
      %c0_21 = arith.constant 0 : index
      %c0_22 = arith.constant 0 : index
      %30 = vector.load %arg7[%c0_21, %c0_22] : memref<16x1xf32, #tpu.memory_space<vmem>>, vector<16x1xf32>
      tpu.vector_store %arg7[%c0_21, %c0_22], %29 {strides = array<i32>} : memref<16x1xf32, #tpu.memory_space<vmem>>, vector<16x1xf32>,
      %cst_23 = arith.constant 0.000000e+00 : f32
      %31 = vector.broadcast %cst_23 : f32 to vector<16x1xf32>
      %c0_24 = arith.constant 0 : index
      %c0_25 = arith.constant 0 : index
      %32 = vector.load %arg8[%c0_24, %c0_25] : memref<16x1xf32, #tpu.memory_space<vmem>>, vector<16x1xf32>
      tpu.vector_store %arg8[%c0_24, %c0_25], %31 {strides = array<i32>} : memref<16x1xf32, #tpu.memory_space<vmem>>, vector<16x1xf32>,
    } else {
    }
    %c0 = arith.constant 0 : index
    %c0_1 = arith.constant 0 : index
    %3 = vector.load %arg2[%c0, %c0_1] : memref<16x32xbf16, #tpu.memory_space<vmem>>, vector<16x32xbf16>
    %c0_2 = arith.constant 0 : index
    %c0_3 = arith.constant 0 : index
    %4 = vector.load %arg3[%c0_2, %c0_3] : memref<32x128xbf16, #tpu.memory_space<vmem>>, vector<32x128xbf16>
    %cst = arith.constant dense<0.000000e+00> : vector<16x128xf32>
    %5 = tpu.matmul %3, %4, %cst {dimension_numbers = #tpu.dot_dimension_numbers<[1], [0], [0], [1], [0, 0, 1, 1], [], []>} : vector<16x32xbf16>, vector<32x128xbf16>, vector<16x128xf32> -> vector<16x128xf32>
    %c0_4 = arith.constant 0 : index
    %c0_5 = arith.constant 0 : index
    %6 = vector.load %arg4[%c0_4, %c0_5] : memref<1x128xf32, #tpu.memory_space<vmem>>, vector<1x128xf32>
    %7 = vector.broadcast %6 : vector<1x128xf32> to vector<16x128xf32>
    %8 = arith.addf %5, %7 : vector<16x128xf32>
    %c0_6 = arith.constant 0 : index
    %c0_7 = arith.constant 0 : index
    %9 = vector.load %arg7[%c0_6, %c0_7] : memref<16x1xf32, #tpu.memory_space<vmem>>, vector<16x1xf32>
    %cst_8 = arith.constant dense<0xFF800000> : vector<16xf32>
    %10 = vector.multi_reduction <maximumf>, %8, %cst_8 [1] : vector<16x128xf32> to vector<16xf32>
    %11 = vector.shape_cast %10 : vector<16xf32> to vector<16x1xf32>
    %12 = arith.maximumf %9, %11 : vector<16x1xf32>
    %13 = arith.subf %9, %12 : vector<16x1xf32>
    %14 = math.exp %13 : vector<16x1xf32>
    %c0_9 = arith.constant 0 : index
    %c0_10 = arith.constant 0 : index
    %15 = vector.load %arg8[%c0_9, %c0_10] : memref<16x1xf32, #tpu.memory_space<vmem>>, vector<16x1xf32>
    %16 = arith.mulf %14, %15 : vector<16x1xf32>
    %17 = vector.broadcast %12 : vector<16x1xf32> to vector<16x128xf32>
    %18 = arith.subf %8, %17 : vector<16x128xf32>
    %19 = math.exp %18 : vector<16x128xf32>
    %cst_11 = arith.constant dense<0.000000e+00> : vector<16xf32>
    %20 = vector.multi_reduction <add>, %19, %cst_11 [1] : vector<16x128xf32> to vector<16xf32>
    %21 = vector.shape_cast %20 : vector<16xf32> to vector<16x1xf32>
    %22 = arith.addf %16, %21 : vector<16x1xf32>
    %c0_12 = arith.constant 0 : index
    %c0_13 = arith.constant 0 : index
    %23 = vector.load %arg8[%c0_12, %c0_13] : memref<16x1xf32, #tpu.memory_space<vmem>>, vector<16x1xf32>
    tpu.vector_store %arg8[%c0_12, %c0_13], %22 {strides = array<i32>} : memref<16x1xf32, #tpu.memory_space<vmem>>, vector<16x1xf32>,
    %c0_14 = arith.constant 0 : index
    %c0_15 = arith.constant 0 : index
    %24 = vector.load %arg7[%c0_14, %c0_15] : memref<16x1xf32, #tpu.memory_space<vmem>>, vector<16x1xf32>
    tpu.vector_store %arg7[%c0_14, %c0_15], %12 {strides = array<i32>} : memref<16x1xf32, #tpu.memory_space<vmem>>, vector<16x1xf32>,
    %c0_16 = arith.constant 0 : index
    %c0_17 = arith.constant 0 : index
    %25 = vector.load %arg5[%c0_16, %c0_17] : memref<16x128xf32, #tpu.memory_space<vmem>>, vector<16x128xf32>
    tpu.vector_store %arg5[%c0_16, %c0_17], %8 {strides = array<i32>} : memref<16x128xf32, #tpu.memory_space<vmem>>, vector<16x128xf32>,
    %c0_i32_18 = arith.constant 0 : i32
    %26 = arith.cmpi eq, %arg1, %c0_i32_18 : i32
    %27 = arith.extui %26 : i1 to i32
    %c0_i32_19 = arith.constant 0 : i32
    %28 = arith.cmpi ne, %27, %c0_i32_19 : i32
    scf.if %28 {
      %c0_20 = arith.constant 0 : index
      %c0_21 = arith.constant 0 : index
      %29 = vector.load %arg7[%c0_20, %c0_21] : memref<16x1xf32, #tpu.memory_space<vmem>>, vector<16x1xf32>
      %c0_22 = arith.constant 0 : index
      %c0_23 = arith.constant 0 : index
      %30 = vector.load %arg8[%c0_22, %c0_23] : memref<16x1xf32, #tpu.memory_space<vmem>>, vector<16x1xf32>
      %31 = math.log %30 : vector<16x1xf32>
      %32 = arith.addf %29, %31 : vector<16x1xf32>
      %c0_24 = arith.constant 0 : index
      %c0_25 = arith.constant 0 : index
      %33 = vector.load %arg6[%c0_24, %c0_25] : memref<16x1xf32, #tpu.memory_space<vmem>>, vector<16x1xf32>
      tpu.vector_store %arg6[%c0_24, %c0_25], %32 {strides = array<i32>} : memref<16x1xf32, #tpu.memory_space<vmem>>, vector<16x1xf32>,
    } else {
    }
    return
  }
  func.func @transform_0(%arg0: i32, %arg1: i32) -> (i32, i32) {
    %c0_i32 = arith.constant 0 : i32
    %c0_i32_0 = arith.constant 0 : i32
    return %arg0, %c0_i32 : i32, i32
  }
  func.func @transform_1(%arg0: i32, %arg1: i32) -> (i32, i32) {
    %c0_i32 = arith.constant 0 : i32
    %c0_i32_0 = arith.constant 0 : i32
    return %c0_i32, %arg1 : i32, i32
  }
  func.func @transform_2(%arg0: i32, %arg1: i32) -> (i32, i32) {
    %c0_i32 = arith.constant 0 : i32
    %c0_i32_0 = arith.constant 0 : i32
    return %c0_i32, %arg1 : i32, i32
  }
  func.func @transform_3(%arg0: i32, %arg1: i32) -> (i32, i32) {
    %c0_i32 = arith.constant 0 : i32
    return %arg0, %arg1 : i32, i32
  }
  func.func @transform_4(%arg0: i32, %arg1: i32) -> (i32, i32) {
    %c0_i32 = arith.constant 0 : i32
    %c0_i32_0 = arith.constant 0 : i32
    return %arg0, %c0_i32 : i32, i32
  }
}

</mosaic_0001>

<bundles_post_ra>
// kernel: tpu_custom_call.1
= control target key start
LH: loop header
LB: loop body
LE: loop exit
PB: predicated region body
PF: predicated region fallthrough
CT: control target
= control target key end

     0   :  { %10 = vsyncpa [#allocation5], 0  ;;  %s388_s0 = inlined_call_operand.hbm [shape: bf16[16,32], index: 0, kind: input, shape index: {}]   ;;  %s389_s1 = inlined_call_operand.hbm [shape: bf16[32,128], index: 1, kind: input, shape index: {}]   ;;  %s390_s2 = inlined_call_operand.vmem [shape: f32[1,128], index: 2, kind: input, shape index: {}]   ;;  %s391_s3 = inlined_call_operand.hbm [shape: f32[16,128], index: 3, kind: output, shape index: {0}]   ;;  %s392_s4 = inlined_call_operand.vmem [shape: f32[16,1], index: 4, kind: output, shape index: {1}]  }
   0x1   :  { %11 = vsyncpa [#allocation8], 0 }
   0x2   :  { %12 = vsyncpa [#allocation6], 0  ;;  %s324_s15 = smov [#allocation4]  }
   0x3   :  { %s18_s16 = sshll.u32 %s324_s15, 4  ;;  %s19_s16 = int_to_ptr.vmem [resolvable:$true] %s18_s16 }
   0x4   :  { %s266_s17 = scalar_lea.vmem %s19_s16, 128  ;;  %p271_p1 = scmp.lt.s32.totalorder %s19_s16, %s19_s16 }
   0x5   :  { %p267_p0 = scmp.ne.s32.totalorder %s19_s16, %s266_s17  ;;  %p272_p2 = scmp.lt.s32.totalorder %s266_s17, %s266_s17 }
   0x7   :  { %p273_p3 = por %p272_p2, %p271_p1 }
   0x9   :  { %p274_p4 = pnand %p273_p3, %p267_p0 }
   0xb   :  { %277 = shalt.err (!%p274_p4)
}
   0xc   :  { %s325_s18 = smov 64   ;;  %s326_s19 = smov 4  }
   0xd   :  { %24 = dma.hbm_to_vmem [thread:$0]  %s388_s0, 128, %s19_s16, [#allocation5], %s325_s18, %s325_s18, %s326_s19  }
   0xe   :  { %s327_s22 = smov [#allocation7]  }
   0xf   :  { %s30_s23 = sshll.u32 %s327_s22, 4  ;;  %s31_s23 = int_to_ptr.vmem [resolvable:$true] %s30_s23 }
  0x10   :  { %s286_s24 = scalar_lea.vmem %s31_s23, 256  ;;  %p291_p6 = scmp.lt.s32.totalorder %s31_s23, %s31_s23 }
  0x11   :  { %p287_p5 = scmp.ne.s32.totalorder %s31_s23, %s286_s24  ;;  %p292_p7 = scmp.lt.s32.totalorder %s286_s24, %s286_s24 }
  0x13   :  { %p293_p8 = por %p292_p7, %p291_p6 }
  0x15   :  { %p294_p9 = pnand %p293_p8, %p287_p5 }
  0x17   :  { %297 = shalt.err (!%p294_p9)
}
  0x18   :  { %36 = dma.hbm_to_vmem [thread:$0]  %s389_s1, 256, %s31_s23, [#allocation8], %s325_s18, %s325_s18, %s326_s19  }
  0x19   :  { %318 = dma.done.wait [#allocation5], 128  }
  0x1a   :  { %319 = vsyncadd [#allocation5], 4294967168 }
  0x1b   :  { %320 = dma.done.wait [#allocation8], 256  }
  0x1c   :  { %321 = vsyncadd [#allocation8], 4294967040  ;;  %vm50_vm0 = vcmask 7168   ;;  %v328_v0 = vmov 0.0   ;;  %vm329_vm1 = vmmov 0   ;;  %v243_v1 = vld [vmem:[#allocation7 + $0x8] sm:$0xff]  }
  0x1d   :  { %53 = vst.msk [vmem:[#allocation3] sm:$0xff] %vm50_vm0, %v328_v0  ;;  %54 = vst.msk [vmem:[#allocation3 + $0x8] sm:$0xff] %vm50_vm0, %v328_v0  ;;  %222 = vmatprep.subr.bf16.mxu0 %v328_v0  ;;  %226 = vmatprep.mubr.msk.bf16.mxu0 %vm329_vm1, %v328_v0  ;;  %v244_v2 = vld [vmem:[#allocation7] sm:$0xff]   ;;  %v245_v3 = vld [vmem:[#allocation4] sm:$0xff]   ;;  %vm85_vm2 = vcmask 261120   ;;  %v330_v4 = vmov -inf  }
  0x1e   :  { %223 = vmatpush3.bf16.msra.mxu0 %v243_v1  ;;  %51 = vst.msk [vmem:[#allocation2] sm:$0xff] %vm50_vm0, %v330_v4  ;;  %52 = vst.msk [vmem:[#allocation2 + $0x8] sm:$0xff] %vm50_vm0, %v330_v4  ;;  %v214_v5 = vld [vmem:[%s390_s2] ss:$0 sm:$0xff]  ;;  %v331_v12 = vmov 0   ;;  %s332_s2 = smov [#allocation9]  }
  0x1f   :  { %224 = vmatprep.subr.bf16.mxu0 %v328_v0  ;;  %241 = vset.pattern.permute.xlu1 %v331_v12  ;;  %s197_s27 = sshll.u32 %s332_s2, 4  ;;  %s198_s27 = int_to_ptr.vmem [resolvable:$true] %s197_s27 }
  0x20   :  { %242 = vset.pattern.permute.xlu0 %v331_v12  ;;  %s298_s28 = scalar_lea.vmem %s198_s27, 256  ;;  %p303_p11 = scmp.lt.s32.totalorder %s198_s27, %s198_s27 }
  0x21   :  { %p299_p10 = scmp.ne.s32.totalorder %s198_s27, %s298_s28  ;;  %p304_p12 = scmp.lt.s32.totalorder %s298_s28, %s298_s28 }
  0x22   :  { %225 = vmatpush3.bf16.msra.mxu0 %v244_v2 }
  0x23   :  { %p305_p13 = por %p304_p12, %p303_p11 }
  0x25   :  { %227 = vmatmul.mubr.msk.bf16.vlgmr.msra.gmra.mxu0 %vm85_vm2, %v245_v3  ;;  %v130_v13 = vld [vmem:[#allocation2] sm:$0xff]  ;;  %v131_v16 = vld [vmem:[#allocation2 + $0x8] sm:$0xff]  ;;  %p306_p0 = pnand %p305_p13, %p299_p10 }
  0xe5   :  { %v123_v6 = vpop.f32.mrf.mxu0 }
  0xe6   :  { %v124_v7 = vadd.f32 %v214_v5, %v123_v6 }
  0xe7   :  { %v228_v8 = vpop.f32.mrf.mxu0 }
  0xe8   :  { %175 = vst [vmem:[#allocation9] sm:$0xff] %v124_v7  ;;  %132 = vmax.xlane.f32.xlu0 %v124_v7 }
  0xe9   :  { %v126_v9 = vpop.f32.mrf.mxu0 }
  0xea   :  { %v127_v10 = vadd.f32 %v214_v5, %v126_v9 }
  0xeb   :  { %v229_v11 = vpop.f32.mrf.mxu0 }
  0xec   :  { %176 = vst [vmem:[#allocation9 + $0x8] sm:$0xff] %v127_v10  ;;  %134 = vmax.xlane.f32.xlu0 %v127_v10 }
 0x171   :  { %v133_v14 = vpop.xlane.xlu0 %132 }
 0x172   :  { %v136_v15 = vmax.f32 %v130_v13, %v133_v14 }
 0x174   :  { %v138_v17 = vsub.f32 %v130_v13, %v136_v15  ;;  %173 = vst.msk [vmem:[#allocation2] sm:$0xff] %vm50_vm0, %v136_v15  ;;  %150 = vperm.xlu1 %241, %v136_v15  }
 0x175   :  { %v135_v18 = vpop.xlane.xlu0 %134 }
 0x176   :  { %v137_v19 = vmax.f32 %v131_v16, %v135_v18 }
 0x178   :  { %v139_v20 = vsub.f32 %v131_v16, %v137_v19  ;;  %174 = vst.msk [vmem:[#allocation2 + $0x8] sm:$0xff] %vm50_vm0, %v137_v19  ;;  %155 = vperm.xlu1 %241, %v137_v19  }
 0x1ef   :  { %v151_v21 = vpop.permute.xlu1 %150 }
 0x1f0   :  { %v158_v22 = vsub.f32 %v124_v7, %v151_v21 }
 0x1f2   :  { %v160_v23 = vmul.f32 1.442695, %v158_v22 }
 0x1f3   :  { %v156_v24 = vpop.permute.xlu1 %155 }
 0x1f4   :  { %246 = vpow2.f32 %v160_v23  ;;  %v159_v25 = vsub.f32 %v127_v10, %v156_v24 }
 0x1f6   :  { %v162_v26 = vmul.f32 1.442695, %v159_v25 }
 0x1f8   :  { %248 = vpow2.f32 %v162_v26 }
 0x201   :  { %v247_v27 = vpop.eup %246 }
 0x202   :  { %164 = vadd.xlane.f32.xlu0 %v247_v27 }
 0x205   :  { %v249_v28 = vpop.eup %248 }
 0x206   :  { %166 = vadd.xlane.f32.xlu1 %v249_v28 }
 0x207   :  { %309 = shalt.err (!%p306_p0)
}
 0x208   :  { %s333_s29 = smov 128   ;;  %s334_s30 = smov 8   ;;  %v140_v29 = vmul.f32 1.442695, %v138_v17  ;;  %v142_v30 = vmul.f32 1.442695, %v139_v20 }
 0x209   :  { %203 = dma.vmem_to_hbm [thread:$0]  %s198_s27, 256, %s391_s3, [#allocation6], %s333_s29, %s333_s29, %s334_s30   ;;  %v144_v32 = vld [vmem:[#allocation3] sm:$0xff]  ;;  %v145_v36 = vld [vmem:[#allocation3 + $0x8] sm:$0xff]  ;;  %v180_v45 = vld [vmem:[#allocation2] sm:$0xff] }
 0x20a   :  { %250 = vpow2.f32 %v140_v29  ;;  %v181_v49 = vld [vmem:[#allocation2 + $0x8] sm:$0xff] }
 0x20b   :  { %252 = vpow2.f32 %v142_v30 }
 0x217   :  { %v251_v31 = vpop.eup %250 }
 0x218   :  { %v146_v33 = vmul.f32 %v251_v31, %v144_v32  ;;  %v253_v34 = vpop.eup %252 }
 0x219   :  { %v147_v38 = vmul.f32 %v253_v34, %v145_v36 }
 0x28b   :  { %v165_v35 = vpop.xlane.xlu0 %164 }
 0x28c   :  { %v168_v37 = vadd.f32 %v165_v35, %v146_v33 }
 0x28e   :  { %171 = vst.msk [vmem:[#allocation3] sm:$0xff] %vm50_vm0, %v168_v37 }
 0x28f   :  { %v167_v39 = vpop.xlane.xlu1 %166 }
 0x290   :  { %v169_v40 = vadd.f32 %v167_v39, %v147_v38 }
 0x292   :  { %172 = vst.msk [vmem:[#allocation3 + $0x8] sm:$0xff] %vm50_vm0, %v169_v40 }
 0x295   :  { %v182_v41 = vld [vmem:[#allocation3] sm:$0xff] }
 0x296   :  { %254 = vlog2.f32 %v182_v41 }
 0x299   :  { %v183_v42 = vld [vmem:[#allocation3 + $0x8] sm:$0xff] }
 0x29a   :  { %256 = vlog2.f32 %v183_v42 }
 0x2a3   :  { %v255_v43 = vpop.eup %254 }
 0x2a4   :  { %v185_v44 = vmul.f32 0.6931472, %v255_v43 }
 0x2a6   :  { %v188_v46 = vadd.f32 %v185_v44, %v180_v45 }
 0x2a7   :  { %v257_v47 = vpop.eup %256 }
 0x2a8   :  { %190 = vst.msk [vmem:[%s392_s4] sm:$0xff] %vm50_vm0, %v188_v46  ;;  %v187_v48 = vmul.f32 0.6931472, %v257_v47 }
 0x2aa   :  { %v189_v50 = vadd.f32 %v187_v48, %v181_v49 }
 0x2ac   :  { %191 = vst.msk [vmem:[%s392_s4 + $0x8] sm:$0xff] %vm50_vm0, %v189_v50 }
 0x2ad   :  { %322 = dma.done.wait [#allocation6], 256  }
 0x2ae   :  { %323 = vsyncadd [#allocation6], 4294967040 }
 0x2af   :  { %211 = vsyncpa [#allocation5], 1 }
 0x2b0   :  { %212 = vsyncpa [#allocation8], 1 }
 0x2b1   :  { %213 = vsyncpa [#allocation6], 1 }

</bundles_post_ra>
